<compile_context>
chip_gen: v7x
topology: tpu7x:2x2x1
jax: 0.10.0
libtpu: 0.0.40
codegen_flags: <defaults>
</compile_context>

<pallas_src>
import functools

import jax
import jax.numpy as jnp
import numpy as np
from jax.experimental import pallas as pl
from jax.experimental.pallas import tpu as pltpu


def _round_up(v, m):
    return ((v + m - 1) // m) * m


@functools.lru_cache(maxsize=None)
def _vmem_budgets():
    """(working-set budget, vmem_limit_bytes) sized to this chip generation."""
    cap = 64 * 1024 * 1024                     # v7x-safe default (64 MiB / TC)
    try:
        queried = int(pltpu.get_tpu_info().vmem_capacity_bytes)
        if queried > 0:
            cap = queried
    except Exception:
        pass
    budget = int(cap * 0.68)                   # ~44 MiB v7x, ~87 MiB v5e/v6e
    limit = min(int(cap * 0.85), 112 * 1024 * 1024)
    return budget, limit


# ---------------------------------------------------------------------------
# Weight pre-packing (runs once, outside the jitted forward path).
# ---------------------------------------------------------------------------

def pack_params(params, compute_dtype=jnp.bfloat16):
    """Pre-cast + lane-pad parameters once.

    Weight columns / biases are zero-padded to multiples of 128 (lane-dense
    outputs); weight rows of layer i>0 are padded to the padded output width
    of layer i-1.  Layer 0 keeps its true input width so the activation never
    needs a K-padding copy.  Returns [(w_bf16_padded, b_f32_padded[1, Npad])].
    """
    packed = []
    prev_pad = None
    for idx, (w, b) in enumerate(params):
        d_in, d_out = w.shape
        d_out_pad = _round_up(d_out, 128)
        d_in_pad = d_in if idx == 0 else prev_pad
        assert idx == 0 or d_in <= prev_pad
        w_p = jnp.pad(w.astype(compute_dtype),
                      ((0, d_in_pad - d_in), (0, d_out_pad - d_out)))
        b_p = jnp.pad(b.astype(jnp.float32).reshape(1, d_out),
                      ((0, 0), (0, d_out_pad - d_out)))
        packed.append((w_p, b_p))
        prev_pad = d_out_pad
    return packed


# ---------------------------------------------------------------------------
# Fused whole-MLP kernel (weights resident in VMEM, grid over batch tiles).
# ---------------------------------------------------------------------------

def _mlp_fused_kernel(x_ref, *rest, num_layers, relu_flags, compute_dtype):
    o_ref = rest[-1]
    h = x_ref[...]                               # f32 batch tile
    for i in range(num_layers):
        w_ref = rest[2 * i]
        b_ref = rest[2 * i + 1]
        z = jnp.dot(h.astype(compute_dtype), w_ref[...],
                    preferred_element_type=jnp.float32)
        z = z + b_ref[...]                       # f32 bias, broadcast over rows
        if relu_flags[i]:
            z = jnp.maximum(z, 0.0)
        h = z                                    # stays in VMEM / vregs
    o_ref[...] = h.astype(o_ref.dtype)


def _mlp_fused_call(x, packed, *, compute_dtype, out_dtype):
    """Single-pallas_call MLP. Returns None if the weights don't fit in VMEM."""
    M, d0 = x.shape
    num_layers = len(packed)
    assert packed[0][0].shape[0] == d0
    dims_pad = [w.shape[1] for (w, _) in packed]
    dl_pad = dims_pad[-1]

    x_bytes = x.dtype.itemsize
    out_bytes = np.dtype(out_dtype).itemsize
    budget, vmem_limit = _vmem_budgets()

    # Resident parameter bytes (counted x2: conservative double-buffering).
    param_bytes = sum(2 * (w.size * w.dtype.itemsize + b.size * 4)
                      for (w, b) in packed)

    def working_set(tm):
        return (param_bytes
                + 2 * tm * d0 * x_bytes          # x tile (double buffered)
                + 2 * tm * dl_pad * out_bytes    # output tile
                + 3 * tm * max(dims_pad) * 4)    # live f32/bf16 intermediates

    tm = min(_round_up(M, 8), 512)
    while tm > 8 and working_set(tm) > budget:
        tm = max(8, _round_up(tm // 2, 8))
    if working_set(tm) > budget:
        return None                              # caller falls back per layer

    # Give both v7x TensorCores a batch block when the batch allows it.
    if _round_up(M, tm) // tm == 1 and tm >= 16:
        tm = _round_up(tm // 2, 8)

    m_pad = _round_up(M, tm)
    x_in = x if m_pad == M else jnp.pad(x, ((0, m_pad - M), (0, 0)))

    in_specs = [pl.BlockSpec((tm, d0), lambda i: (i, 0))]
    operands = [x_in]
    for (w_p, b_p) in packed:
        kin, nout = w_p.shape
        in_specs.append(pl.BlockSpec((kin, nout), lambda i: (0, 0)))   # resident
        in_specs.append(pl.BlockSpec((1, nout), lambda i: (0, 0)))     # resident
        operands += [w_p, b_p]

    relu_flags = tuple(i < num_layers - 1 for i in range(num_layers))
    kernel = functools.partial(_mlp_fused_kernel, num_layers=num_layers,
                               relu_flags=relu_flags,
                               compute_dtype=compute_dtype)

    flops = 2 * m_pad * sum(w.shape[0] * w.shape[1] for (w, _) in packed)
    bytes_acc = (x_in.size * x_bytes + m_pad * dl_pad * out_bytes
                 + sum(w.size * w.dtype.itemsize + b.size * 4
                       for (w, b) in packed))

    out = pl.pallas_call(
        kernel,
        out_shape=jax.ShapeDtypeStruct((m_pad, dl_pad), out_dtype),
        grid_spec=pltpu.PrefetchScalarGridSpec(
            num_scalar_prefetch=0,
            grid=(m_pad // tm,),
            in_specs=in_specs,
            out_specs=pl.BlockSpec((tm, dl_pad), lambda i: (i, 0)),
        ),
        compiler_params=pltpu.CompilerParams(
            dimension_semantics=("parallel",),
            vmem_limit_bytes=vmem_limit,
        ),
        cost_estimate=pl.CostEstimate(flops=int(flops), transcendentals=0,
                                      bytes_accessed=int(bytes_acc)),
    )(*operands)
    return out[:M, :]


# ---------------------------------------------------------------------------
# Per-layer fallback (trunks whose weights do not fit in VMEM).
# ---------------------------------------------------------------------------

def _linear_kernel_single(x_ref, w_ref, b_ref, o_ref, *, apply_relu,
                          compute_dtype):
    """Whole K in one tile: no reduction axis, no accumulator."""
    h = jnp.dot(x_ref[...].astype(compute_dtype), w_ref[...],
                preferred_element_type=jnp.float32)
    h = h + b_ref[...]
    if apply_relu:
        h = jnp.maximum(h, 0.0)
    o_ref[...] = h.astype(o_ref.dtype)


def _linear_kernel_multi_alias(x_ref, w_ref, b_ref, o_ref, *, apply_relu,
                               compute_dtype):
    """K-tiled path with f32 output: accumulate directly into o_ref."""
    k = pl.program_id(2)

    @pl.when(k == 0)
    def _():
        o_ref[...] = jnp.zeros_like(o_ref)

    o_ref[...] += jnp.dot(x_ref[...].astype(compute_dtype), w_ref[...],
                          preferred_element_type=jnp.float32)

    @pl.when(k == pl.num_programs(2) - 1)
    def _():
        h = o_ref[...] + b_ref[...]
        if apply_relu:
            h = jnp.maximum(h, 0.0)
        o_ref[...] = h


def _linear_kernel_multi_scratch(x_ref, w_ref, b_ref, o_ref, acc_ref, *,
                                 apply_relu, compute_dtype):
    """K-tiled path with non-f32 output: f32 VMEM accumulator."""
    k = pl.program_id(2)

    @pl.when(k == 0)
    def _():
        acc_ref[...] = jnp.zeros_like(acc_ref)

    acc_ref[...] += jnp.dot(x_ref[...].astype(compute_dtype), w_ref[...],
                            preferred_element_type=jnp.float32)

    @pl.when(k == pl.num_programs(2) - 1)
    def _():
        h = acc_ref[...] + b_ref[...]
        if apply_relu:
            h = jnp.maximum(h, 0.0)
        o_ref[...] = h.astype(o_ref.dtype)


def _choose_tiles(M, N_pad, K, x_bytes, w_bytes, out_bytes, budget):
    """Pick (tm, tn, tk), growing toward the VMEM budget; tn divides N_pad."""
    m_cap = _round_up(M, 8)
    k_cap = _round_up(K, 128)

    def ws(tm, tn, tk):
        return (2 * tm * tk * x_bytes        # double-buffered X tiles
                + 2 * tk * tn * w_bytes      # double-buffered W tiles
                + 2 * tm * tn * out_bytes    # double-buffered output tile
                + tm * tn * 4                # f32 accumulator (worst case)
                + 2 * tn * 4)                # bias tile

    def tn_div(limit):
        t = max(128, (min(N_pad, limit) // 128) * 128)
        while N_pad % t:
            t -= 128
        return t

    tm = min(m_cap, 128)
    tn = tn_div(256)
    tk = min(k_cap, 512)

    # Grow K depth first (fewest grid steps / accumulator revisits), then rows
    # (halves how often W is re-streamed: the dominant cost when weight-BW
    # bound), then lane width.
    while tk < k_cap and ws(tm, tn, min(2 * tk, k_cap)) <= budget:
        tk = min(2 * tk, k_cap)
    while tm < min(m_cap, 512) and ws(min(2 * tm, m_cap, 512), tn, tk) <= budget:
        tm = min(2 * tm, m_cap, 512)
    while True:
        tn2 = tn_div(2 * tn)
        if tn2 <= tn or tn2 > 1024 or ws(tm, tn2, tk) > budget:
            break
        tn = tn2
    while tk > 128 and ws(tm, tn, tk) > budget:
        tk = max(128, tk - 128)

    # Keep >=2 parallel output blocks when possible so both v7x TensorCores
    # get work (near-free on single-TC v5e/v6e).
    if (_round_up(M, tm) // tm) * (N_pad // tn) == 1:
        if tn > 128 and N_pad % (tn // 2) == 0:
            tn //= 2
        elif tm > 8:
            tm = _round_up(tm // 2, 8)
    return tm, tn, tk


def _linear_packed(x, w_p, b_p, *, apply_relu, compute_dtype, out_dtype,
                   tiles=None):
    """out = (relu)(x @ w_p + b_p); rows cropped to M, columns stay padded."""
    M, K = x.shape
    Kw, N_pad = w_p.shape
    assert K == Kw and b_p.shape == (1, N_pad)

    budget, vmem_limit = _vmem_budgets()
    x_bytes = x.dtype.itemsize
    w_bytes = w_p.dtype.itemsize
    out_bytes = np.dtype(out_dtype).itemsize
    if tiles is None:
        tm, tn, tk = _choose_tiles(M, N_pad, K, x_bytes, w_bytes, out_bytes,
                                   budget)
    else:
        tm, tn, tk = tiles
    assert N_pad % tn == 0

    m_pad = _round_up(M, tm)
    x_in = x if m_pad == M else jnp.pad(x, ((0, m_pad - M), (0, 0)))

    if tk >= _round_up(K, 128):
        # K collapsed: block extent = true (unpadded) K, no reduction axis.
        kernel = functools.partial(_linear_kernel_single, apply_relu=apply_relu,
                                   compute_dtype=compute_dtype)
        out = pl.pallas_call(
            kernel,
            out_shape=jax.ShapeDtypeStruct((m_pad, N_pad), out_dtype),
            grid_spec=pltpu.PrefetchScalarGridSpec(
                num_scalar_prefetch=0,
                grid=(m_pad // tm, N_pad // tn),
                in_specs=[
                    pl.BlockSpec((tm, K), lambda i, j: (i, 0)),     # X tile
                    pl.BlockSpec((K, tn), lambda i, j: (0, j)),     # W tile
                    pl.BlockSpec((1, tn), lambda i, j: (0, j)),     # bias tile
                ],
                out_specs=pl.BlockSpec((tm, tn), lambda i, j: (i, j)),
            ),
            compiler_params=pltpu.CompilerParams(
                dimension_semantics=("parallel", "parallel"),
                vmem_limit_bytes=vmem_limit,
            ),
            cost_estimate=pl.CostEstimate(
                flops=int(2 * m_pad * N_pad * K), transcendentals=0,
                bytes_accessed=int(x_in.size * x_bytes + w_p.size * w_bytes
                                   + b_p.size * 4 + m_pad * N_pad * out_bytes)),
        )(x_in, w_p, b_p)
    else:
        # Rare giant-K path: pad K to a tile multiple (only here, per call).
        k_pad = _round_up(K, tk)
        w_in = w_p
        if k_pad != K:
            x_in = jnp.pad(x_in, ((0, 0), (0, k_pad - K)))
            w_in = jnp.pad(w_p, ((0, k_pad - K), (0, 0)))
        use_alias = np.dtype(out_dtype) == np.dtype(jnp.float32)
        if use_alias:
            kernel = functools.partial(_linear_kernel_multi_alias,
                                       apply_relu=apply_relu,
                                       compute_dtype=compute_dtype)
            scratch = []
        else:
            kernel = functools.partial(_linear_kernel_multi_scratch,
                                       apply_relu=apply_relu,
                                       compute_dtype=compute_dtype)
            scratch = [pltpu.VMEM((tm, tn), jnp.float32)]
        out = pl.pallas_call(
            kernel,
            out_shape=jax.ShapeDtypeStruct((m_pad, N_pad), out_dtype),
            grid_spec=pltpu.PrefetchScalarGridSpec(
                num_scalar_prefetch=0,
                grid=(m_pad // tm, N_pad // tn, k_pad // tk),
                in_specs=[
                    pl.BlockSpec((tm, tk), lambda i, j, k: (i, k)),  # X tile
                    pl.BlockSpec((tk, tn), lambda i, j, k: (k, j)),  # W tile
                    pl.BlockSpec((1, tn), lambda i, j, k: (0, j)),   # bias tile
                ],
                out_specs=pl.BlockSpec((tm, tn), lambda i, j, k: (i, j)),
                scratch_shapes=scratch,
            ),
            compiler_params=pltpu.CompilerParams(
                dimension_semantics=("parallel", "parallel", "arbitrary"),
                vmem_limit_bytes=vmem_limit,
            ),
            cost_estimate=pl.CostEstimate(
                flops=int(2 * m_pad * N_pad * k_pad), transcendentals=0,
                bytes_accessed=int(x_in.size * x_bytes + w_in.size * w_bytes
                                   + b_p.size * 4 + m_pad * N_pad * out_bytes)),
        )(x_in, w_in, b_p)
    return out[:M, :]


# ---------------------------------------------------------------------------
# Forward wrapper, init, reference.
# ---------------------------------------------------------------------------

def trunk_and_head_forward(x, packed_params, out_features, *,
                           compute_dtype=jnp.bfloat16, force_per_layer=False):
    """Eval-mode TrunkAndHead forward: trunk -> MiddleNet -> LastNet."""
    out_dtype = x.dtype
    n = len(packed_params)
    out = None
    if not force_per_layer:
        out = _mlp_fused_call(x, packed_params, compute_dtype=compute_dtype,
                              out_dtype=out_dtype)
    if out is None:     # weights too large for VMEM -> per-layer tiled kernels
        h = x
        for idx, (w_p, b_p) in enumerate(packed_params):
            h = _linear_packed(h, w_p, b_p, apply_relu=(idx < n - 1),
                               compute_dtype=compute_dtype, out_dtype=out_dtype)
        out = h
    return out[:, :out_features]


def init_linear_params(key, d_in, d_out, dtype=jnp.float32):
    """Matches TrunkAndHead.init_weights: xavier_uniform_ weight, bias=0.01."""
    bound = float(np.sqrt(6.0 / (d_in + d_out)))
    w = jax.random.uniform(key, (d_in, d_out), dtype=dtype,
                           minval=-bound, maxval=bound)
    b = jnp.full((d_out,), 0.01, dtype=dtype)
    return w, b


def _ref_forward(x, params, compute_dtype):
    """Plain-JAX reference with the same bf16 operand cast as the kernels."""
    h = x.astype(jnp.float32)
    n = len(params)
    for idx, (w, b) in enumerate(params):
        hc = h.astype(compute_dtype).astype(jnp.float32)
        wc = w.astype(compute_dtype).astype(jnp.float32)
        z = hc @ wc + b.astype(jnp.float32)
        if idx < n - 1:
            z = jnp.maximum(z, 0.0)
        h = z
    return h


if __name__ == "__main__":
    # Small shapes consistent with the module: batch=8, input_size=300,
    # hidden_sizes=(256, 192), output_size=50 (non-multiples exercise padding).
    B, D_IN = 8, 300
    HIDDEN = (256, 192)
    D_OUT = 50
    sizes = (D_IN,) + HIDDEN + (D_OUT,)

    key = jax.random.PRNGKey(0)
    kx, kp = jax.random.split(key)
    x = jax.random.normal(kx, (B, D_IN), dtype=jnp.float32)

    layer_keys = jax.random.split(kp, len(sizes) - 1)
    params = [init_linear_params(k, din, dout)
              for k, din, dout in zip(layer_keys, sizes[:-1], sizes[1:])]

    # Pre-pack (cast + pad) the weights ONCE, outside the jitted forward.
    packed = pack_params(params)

    fwd = jax.jit(trunk_and_head_forward,
                  static_argnames=("out_features", "force_per_layer"))

    # Primary path: single fused pallas_call, weights resident in VMEM.
    y = fwd(x, packed, out_features=D_OUT)
    jax.block_until_ready(y)

    y_ref = _ref_forward(x, params, jnp.bfloat16)
    assert y.shape == (B, D_OUT)
    assert jnp.allclose(y, y_ref, atol=5e-3, rtol=5e-3), (
        float(jnp.max(jnp.abs(y - y_ref))))

    # Per-layer fallback path (used when packed weights exceed the VMEM budget).
    y_fb = fwd(x, packed, out_features=D_OUT, force_per_layer=True)
    jax.block_until_ready(y_fb)
    assert jnp.allclose(y_fb, y_ref, atol=5e-3, rtol=5e-3), (
        float(jnp.max(jnp.abs(y_fb - y_ref))))

    # K-tiled (multi-step reduction, accumulate-into-f32-output) path.
    w0p, b0p = packed[0]
    y0 = _linear_packed(x, w0p, b0p, apply_relu=True,
                        compute_dtype=jnp.bfloat16, out_dtype=jnp.float32,
                        tiles=(8, 128, 128))
    jax.block_until_ready(y0)
    w0, b0 = params[0]
    y0_ref = jnp.maximum(
        x.astype(jnp.bfloat16).astype(jnp.float32)
        @ w0.astype(jnp.bfloat16).astype(jnp.float32)
        + b0.astype(jnp.float32), 0.0)
    assert jnp.allclose(y0[:, :HIDDEN[0]], y0_ref, atol=5e-3, rtol=5e-3), (
        float(jnp.max(jnp.abs(y0[:, :HIDDEN[0]] - y0_ref))))

    print("KERNEL_OK")
</pallas_src>

<mosaic_0001>
module attributes {stable_mosaic.version = 11 : i64} {
  func.func @_mlp_fused_kernel(%arg0: i32, %arg1: memref<8x300xf32, #tpu.memory_space<vmem>>, %arg2: memref<300x256xbf16, #tpu.memory_space<vmem>>, %arg3: memref<1x256xf32, #tpu.memory_space<vmem>>, %arg4: memref<256x256xbf16, #tpu.memory_space<vmem>>, %arg5: memref<1x256xf32, #tpu.memory_space<vmem>>, %arg6: memref<256x128xbf16, #tpu.memory_space<vmem>>, %arg7: memref<1x128xf32, #tpu.memory_space<vmem>>, %arg8: memref<8x128xf32, #tpu.memory_space<vmem>>) attributes {dimension_semantics = [#tpu.dimension_semantics<parallel>], iteration_bounds = array<i64: 1>, scalar_prefetch = 0 : i64, scratch_operands = 0 : i64, tpu.core_type = #tpu.core_type<tc>, window_params = [{transform_indices = @transform_0, window_bounds = array<i64: 8, 300>}, {pipeline_mode = #tpu.pipeline_mode<synchronous>, transform_indices = @transform_1, window_bounds = array<i64: 300, 256>}, {pipeline_mode = #tpu.pipeline_mode<synchronous>, transform_indices = @transform_2, window_bounds = array<i64: 1, 256>}, {pipeline_mode = #tpu.pipeline_mode<synchronous>, transform_indices = @transform_3, window_bounds = array<i64: 256, 256>}, {pipeline_mode = #tpu.pipeline_mode<synchronous>, transform_indices = @transform_4, window_bounds = array<i64: 1, 256>}, {pipeline_mode = #tpu.pipeline_mode<synchronous>, transform_indices = @transform_5, window_bounds = array<i64: 256, 128>}, {pipeline_mode = #tpu.pipeline_mode<synchronous>, transform_indices = @transform_6, window_bounds = array<i64: 1, 128>}, {transform_indices = @transform_7, window_bounds = array<i64: 8, 128>}]} {
    %c0 = arith.constant 0 : index
    %c0_0 = arith.constant 0 : index
    %0 = vector.load %arg1[%c0, %c0_0] : memref<8x300xf32, #tpu.memory_space<vmem>>, vector<8x300xf32>
    %1 = arith.truncf %0 : vector<8x300xf32> to vector<8x300xbf16>
    %c0_1 = arith.constant 0 : index
    %c0_2 = arith.constant 0 : index
    %2 = vector.load %arg2[%c0_1, %c0_2] : memref<300x256xbf16, #tpu.memory_space<vmem>>, vector<300x256xbf16>
    %cst = arith.constant dense<0.000000e+00> : vector<8x256xf32>
    %3 = tpu.matmul %1, %2, %cst {dimension_numbers = #tpu.dot_dimension_numbers<[1], [0], [0], [1], [0, 0, 1, 1], [], []>} : vector<8x300xbf16>, vector<300x256xbf16>, vector<8x256xf32> -> vector<8x256xf32>
    %c0_3 = arith.constant 0 : index
    %c0_4 = arith.constant 0 : index
    %4 = vector.load %arg3[%c0_3, %c0_4] : memref<1x256xf32, #tpu.memory_space<vmem>>, vector<1x256xf32>
    %5 = vector.broadcast %4 : vector<1x256xf32> to vector<8x256xf32>
    %6 = arith.addf %3, %5 : vector<8x256xf32>
    %cst_5 = arith.constant 0.000000e+00 : f32
    %7 = vector.broadcast %cst_5 : f32 to vector<8x256xf32>
    %8 = arith.maximumf %6, %7 : vector<8x256xf32>
    %9 = arith.truncf %8 : vector<8x256xf32> to vector<8x256xbf16>
    %c0_6 = arith.constant 0 : index
    %c0_7 = arith.constant 0 : index
    %10 = vector.load %arg4[%c0_6, %c0_7] : memref<256x256xbf16, #tpu.memory_space<vmem>>, vector<256x256xbf16>
    %cst_8 = arith.constant dense<0.000000e+00> : vector<8x256xf32>
    %11 = tpu.matmul %9, %10, %cst_8 {dimension_numbers = #tpu.dot_dimension_numbers<[1], [0], [0], [1], [0, 0, 1, 1], [], []>} : vector<8x256xbf16>, vector<256x256xbf16>, vector<8x256xf32> -> vector<8x256xf32>
    %c0_9 = arith.constant 0 : index
    %c0_10 = arith.constant 0 : index
    %12 = vector.load %arg5[%c0_9, %c0_10] : memref<1x256xf32, #tpu.memory_space<vmem>>, vector<1x256xf32>
    %13 = vector.broadcast %12 : vector<1x256xf32> to vector<8x256xf32>
    %14 = arith.addf %11, %13 : vector<8x256xf32>
    %cst_11 = arith.constant 0.000000e+00 : f32
    %15 = vector.broadcast %cst_11 : f32 to vector<8x256xf32>
    %16 = arith.maximumf %14, %15 : vector<8x256xf32>
    %17 = arith.truncf %16 : vector<8x256xf32> to vector<8x256xbf16>
    %c0_12 = arith.constant 0 : index
    %c0_13 = arith.constant 0 : index
    %18 = vector.load %arg6[%c0_12, %c0_13] : memref<256x128xbf16, #tpu.memory_space<vmem>>, vector<256x128xbf16>
    %cst_14 = arith.constant dense<0.000000e+00> : vector<8x128xf32>
    %19 = tpu.matmul %17, %18, %cst_14 {dimension_numbers = #tpu.dot_dimension_numbers<[1], [0], [0], [1], [0, 0, 1, 1], [], []>} : vector<8x256xbf16>, vector<256x128xbf16>, vector<8x128xf32> -> vector<8x128xf32>
    %c0_15 = arith.constant 0 : index
    %c0_16 = arith.constant 0 : index
    %20 = vector.load %arg7[%c0_15, %c0_16] : memref<1x128xf32, #tpu.memory_space<vmem>>, vector<1x128xf32>
    %21 = vector.broadcast %20 : vector<1x128xf32> to vector<8x128xf32>
    %22 = arith.addf %19, %21 : vector<8x128xf32>
    %c0_17 = arith.constant 0 : index
    %c0_18 = arith.constant 0 : index
    %23 = vector.load %arg8[%c0_17, %c0_18] : memref<8x128xf32, #tpu.memory_space<vmem>>, vector<8x128xf32>
    tpu.vector_store %arg8[%c0_17, %c0_18], %22 {strides = array<i32>} : memref<8x128xf32, #tpu.memory_space<vmem>>, vector<8x128xf32>,
    return
  }
  func.func @transform_0(%arg0: i32) -> (i32, i32) {
    %c0_i32 = arith.constant 0 : i32
    %c0_i32_0 = arith.constant 0 : i32
    return %arg0, %c0_i32 : i32, i32
  }
  func.func @transform_1(%arg0: i32) -> (i32, i32) {
    %c0_i32 = arith.constant 0 : i32
    %c0_i32_0 = arith.constant 0 : i32
    %c0_i32_1 = arith.constant 0 : i32
    return %c0_i32, %c0_i32_0 : i32, i32
  }
  func.func @transform_2(%arg0: i32) -> (i32, i32) {
    %c0_i32 = arith.constant 0 : i32
    %c0_i32_0 = arith.constant 0 : i32
    %c0_i32_1 = arith.constant 0 : i32
    return %c0_i32, %c0_i32_0 : i32, i32
  }
  func.func @transform_3(%arg0: i32) -> (i32, i32) {
    %c0_i32 = arith.constant 0 : i32
    %c0_i32_0 = arith.constant 0 : i32
    %c0_i32_1 = arith.constant 0 : i32
    return %c0_i32, %c0_i32_0 : i32, i32
  }
  func.func @transform_4(%arg0: i32) -> (i32, i32) {
    %c0_i32 = arith.constant 0 : i32
    %c0_i32_0 = arith.constant 0 : i32
    %c0_i32_1 = arith.constant 0 : i32
    return %c0_i32, %c0_i32_0 : i32, i32
  }
  func.func @transform_5(%arg0: i32) -> (i32, i32) {
    %c0_i32 = arith.constant 0 : i32
    %c0_i32_0 = arith.constant 0 : i32
    %c0_i32_1 = arith.constant 0 : i32
    return %c0_i32, %c0_i32_0 : i32, i32
  }
  func.func @transform_6(%arg0: i32) -> (i32, i32) {
    %c0_i32 = arith.constant 0 : i32
    %c0_i32_0 = arith.constant 0 : i32
    %c0_i32_1 = arith.constant 0 : i32
    return %c0_i32, %c0_i32_0 : i32, i32
  }
  func.func @transform_7(%arg0: i32) -> (i32, i32) {
    %c0_i32 = arith.constant 0 : i32
    %c0_i32_0 = arith.constant 0 : i32
    return %arg0, %c0_i32 : i32, i32
  }
}

</mosaic_0001>

<bundles_post_ra>
// kernel: trunk_and_head_forward.1
= control target key start
LH: loop header
LB: loop body
LE: loop exit
PB: predicated region body
PF: predicated region fallthrough
CT: control target
= control target key end

     0   :  { %12 = vsyncpa [#allocation3], 0  ;;  %s1355_s0 = inlined_call_operand.hbm [shape: f32[8,300], index: 0, kind: input, shape index: {}]   ;;  %s1356_s1 = inlined_call_operand.hbm [shape: bf16[300,256], index: 1, kind: input, shape index: {}]   ;;  %s1357_s2 = inlined_call_operand.vmem [shape: f32[1,256], index: 2, kind: input, shape index: {}]   ;;  %s1358_s3 = inlined_call_operand.hbm [shape: bf16[256,256], index: 3, kind: input, shape index: {}]   ;;  %s1359_s4 = inlined_call_operand.vmem [shape: f32[1,256], index: 4, kind: input, shape index: {}]   ;;  %s1360_s5 = inlined_call_operand.hbm [shape: bf16[256,128], index: 5, kind: input, shape index: {}]   ;;  %s1361_s6 = inlined_call_operand.vmem [shape: f32[1,128], index: 6, kind: input, shape index: {}]   ;;  %s1362_s7 = inlined_call_operand.hbm [shape: f32[8,128], index: 7, kind: output, shape index: {}]  }
   0x1   :  { %13 = vsyncpa [#allocation6], 0 }
   0x2   :  { %14 = vsyncpa [#allocation9], 0 }
   0x3   :  { %15 = vsyncpa [#allocation4], 0  ;;  %s1230_s24 = smov [#allocation5]   ;;  %s1112_s28 = scalar_lea.hbm %s1356_s1, 4864 }
   0x4   :  { %s31_s25 = sshll.u32 %s1230_s24, 4  ;;  %p1113_p0 = scmp.ne.s32.totalorder %s1356_s1, %s1112_s28  ;;  %s32_s25 = int_to_ptr.vmem [resolvable:$true] %s31_s25 }
   0x5   :  { %p1116_p1 = scmp.lt.u32.totalorder %s1112_s28, %s1356_s1 }
   0x7   :  { %p1118_p2 = pnand %p1116_p1, %p1113_p0 }
   0x9   :  { %1121 = shalt.err (!%p1118_p2)
}
   0xa   :  { %s1122_s10 = scalar_lea.vmem %s32_s25, 4864  ;;  %p1127_p4 = scmp.lt.s32.totalorder %s32_s25, %s32_s25 }
   0xb   :  { %p1123_p3 = scmp.ne.s32.totalorder %s32_s25, %s1122_s10  ;;  %p1128_p5 = scmp.lt.s32.totalorder %s1122_s10, %s1122_s10 }
   0xd   :  { %p1129_p6 = por %p1128_p5, %p1127_p4 }
   0xf   :  { %p1130_p7 = pnand %p1129_p6, %p1123_p3 }
  0x11   :  { %1133 = shalt.err (!%p1130_p7)
}
  0x12   :  { %s1231_s11 = smov 128   ;;  %s1232_s12 = smov 8  }
  0x13   :  { %37 = dma.hbm_to_vmem [thread:$0]  %s1356_s1, 4864, %s32_s25, [#allocation6], %s1231_s11, %s1231_s11, %s1232_s12  }
  0x14   :  { %s1233_s15 = smov [#allocation2]   ;;  %s1234_s17 = smov [#allocation7]  }
  0x15   :  { %s22_s16 = sshll.u32 %s1233_s15, 4  ;;  %s45_s18 = sshll.u32 %s1234_s17, 4  ;;  %s23_s16 = int_to_ptr.vmem [resolvable:$true] %s22_s16  ;;  %s46_s18 = int_to_ptr.vmem [resolvable:$true] %s45_s18 }
  0x16   :  { %s1134_s21 = scalar_lea.hbm %s1355_s0, 384 }
  0x17   :  { %p1135_p8 = scmp.ne.s32.totalorder %s1355_s0, %s1134_s21  ;;  %p1138_p9 = scmp.lt.u32.totalorder %s1134_s21, %s1355_s0 }
  0x19   :  { %p1140_p10 = pnand %p1138_p9, %p1135_p8 }
  0x1b   :  { %1143 = shalt.err (!%p1140_p10)
}
  0x1c   :  { %s1144_s1 = scalar_lea.vmem %s23_s16, 384  ;;  %p1149_p12 = scmp.lt.s32.totalorder %s23_s16, %s23_s16 }
  0x1d   :  { %p1145_p11 = scmp.ne.s32.totalorder %s23_s16, %s1144_s1  ;;  %p1150_p13 = scmp.lt.s32.totalorder %s1144_s1, %s1144_s1 }
  0x1f   :  { %p1151_p0 = por %p1150_p13, %p1149_p12 }
  0x21   :  { %p1152_p1 = pnand %p1151_p0, %p1145_p11 }
  0x23   :  { %1155 = shalt.err (!%p1152_p1)
}
  0x24   :  { %25 = dma.hbm_to_vmem [thread:$0]  %s1355_s0, 384, %s23_s16, [#allocation3]  }
  0x25   :  { %s1156_s30 = scalar_lea.hbm %s1358_s3, 4096 }
  0x26   :  { %p1157_p2 = scmp.ne.s32.totalorder %s1358_s3, %s1156_s30  ;;  %p1160_p3 = scmp.lt.u32.totalorder %s1156_s30, %s1358_s3 }
  0x28   :  { %p1162_p4 = pnand %p1160_p3, %p1157_p2 }
  0x2a   :  { %1165 = shalt.err (!%p1162_p4)
}
  0x2b   :  { %s1166_s14 = scalar_lea.vmem %s46_s18, 4096  ;;  %p1171_p6 = scmp.lt.s32.totalorder %s46_s18, %s46_s18 }
  0x2c   :  { %p1167_p5 = scmp.ne.s32.totalorder %s46_s18, %s1166_s14  ;;  %p1172_p7 = scmp.lt.s32.totalorder %s1166_s14, %s1166_s14 }
  0x2e   :  { %p1173_p8 = por %p1172_p7, %p1171_p6 }
  0x30   :  { %p1174_p9 = pnand %p1173_p8, %p1167_p5 }
  0x32   :  { %1177 = shalt.err (!%p1174_p9)
}
  0x33   :  { %51 = dma.hbm_to_vmem [thread:$0]  %s1358_s3, 4096, %s46_s18, [#allocation6], %s1231_s11, %s1231_s11, %s1232_s12  }
  0x34   :  { %s1235_s16 = smov [#allocation8]   ;;  %s1178_s21 = scalar_lea.hbm %s1360_s5, 2048 }
  0x35   :  { %s59_s17 = sshll.u32 %s1235_s16, 4  ;;  %p1179_p10 = scmp.ne.s32.totalorder %s1360_s5, %s1178_s21  ;;  %s60_s17 = int_to_ptr.vmem [resolvable:$true] %s59_s17 }
  0x36   :  { %p1182_p11 = scmp.lt.u32.totalorder %s1178_s21, %s1360_s5 }
  0x38   :  { %p1184_p12 = pnand %p1182_p11, %p1179_p10 }
  0x3a   :  { %1187 = shalt.err (!%p1184_p12)
}
  0x3b   :  { %s1188_s1 = scalar_lea.vmem %s60_s17, 2048  ;;  %p1193_p0 = scmp.lt.s32.totalorder %s60_s17, %s60_s17 }
  0x3c   :  { %p1189_p13 = scmp.ne.s32.totalorder %s60_s17, %s1188_s1  ;;  %p1194_p1 = scmp.lt.s32.totalorder %s1188_s1, %s1188_s1 }
  0x3e   :  { %p1195_p2 = por %p1194_p1, %p1193_p0 }
  0x40   :  { %p1196_p3 = pnand %p1195_p2, %p1189_p13 }
  0x42   :  { %1199 = shalt.err (!%p1196_p3)
}
  0x43   :  { %s1236_s3 = smov 64   ;;  %s1237_s11 = smov 4  }
  0x44   :  { %65 = dma.hbm_to_vmem [thread:$0]  %s1360_s5, 2048, %s60_s17, [#allocation9], %s1236_s3, %s1236_s3, %s1237_s11  }
  0x45   :  { %1222 = dma.done.wait [#allocation3], 384  }
  0x46   :  { %1223 = vsyncadd [#allocation3], 4294966912 }
  0x47   :  { %1224 = dma.done.wait [#allocation6], 8960  }
  0x48   :  { %1225 = vsyncadd [#allocation6], 4294958336 }
  0x49   :  { %1226 = dma.done.wait [#allocation9], 2048  }
  0x4a   :  { %1227 = vsyncadd [#allocation9], 4294965248  ;;  %v991_v0 = vld [vmem:[#allocation5 + $0x4] ss:$8 sps:$4 sm:$0xff]   ;;  %v993_v1 = vld [vmem:[#allocation5] ss:$8 sps:$4 sm:$0xff]  }
  0x4b   :  { %336 = vmatprep.subr.bf16.mxu0 %v991_v0  ;;  %v994_v2 = vld [vmem:[#allocation5 + $0x14] ss:$8 sps:$4 sm:$0xff]   ;;  %v996_v3 = vld [vmem:[#allocation5 + $0x10] ss:$8 sps:$4 sm:$0xff]   ;;  %v997_v4 = vld [vmem:[#allocation5 + $0x24] ss:$8 sps:$4 sm:$0xff]  }
  0x4c   :  { %337 = vmatpush1.bf16.msra.mxu0 %v993_v1  ;;  %v999_v5 = vld [vmem:[#allocation5 + $0x20] ss:$8 sps:$4 sm:$0xff]   ;;  %v1000_v6 = vld [vmem:[#allocation5 + $0x34] ss:$8 sps:$4 sm:$0xff]   ;;  %v1002_v7 = vld [vmem:[#allocation5 + $0x30] ss:$8 sps:$4 sm:$0xff]  }
  0x4d   :  { %338 = vmatprep.subr.bf16.mxu0 %v994_v2  ;;  %v1003_v8 = vld [vmem:[#allocation5 + $0x44] ss:$8 sps:$4 sm:$0xff]   ;;  %v1005_v9 = vld [vmem:[#allocation5 + $0x40] ss:$8 sps:$4 sm:$0xff]   ;;  %v1006_v10 = vld [vmem:[#allocation5 + $0x54] ss:$8 sps:$4 sm:$0xff]  }
  0x4e   :  { %v1008_v11 = vld [vmem:[#allocation5 + $0x50] ss:$8 sps:$4 sm:$0xff]   ;;  %v1009_v12 = vld [vmem:[#allocation5 + $0x64] ss:$8 sps:$4 sm:$0xff]   ;;  %v1011_v15 = vld [vmem:[#allocation5 + $0x60] ss:$8 sps:$4 sm:$0xff]  }
  0x4f   :  { %v82_v13 = vld [vmem:[#allocation2 + $0x8] sm:$0xff]  ;;  %v1015_v20 = vld [vmem:[#allocation5 + $0x84] ss:$8 sps:$4 sm:$0xff]   ;;  %v1053_v22 = vld [vmem:[#allocation7 + $0x10] ss:$8 sps:$4 sm:$0xff]   ;;  %v1238_v62 = vmov 0  }
  0x50   :  { %339 = vmatpush1.bf16.msra.mxu0 %v996_v3  ;;  %v85_v14 = vpack.c.bf16 %v82_v13, %v82_v13  ;;  %v1012_v16 = vld [vmem:[#allocation5 + $0x74] ss:$8 sps:$4 sm:$0xff]   ;;  %v1014_v17 = vld [vmem:[#allocation5 + $0x70] ss:$8 sps:$4 sm:$0xff]   ;;  %v1051_v21 = vld [vmem:[#allocation7 + $0x14] ss:$8 sps:$4 sm:$0xff]  }
  0x51   :  { %340 = vmatprep.subr.bf16.mxu0 %v997_v4  ;;  %v1048_v18 = vld [vmem:[#allocation7 + $0x4] ss:$8 sps:$4 sm:$0xff]   ;;  %v1050_v19 = vld [vmem:[#allocation7] ss:$8 sps:$4 sm:$0xff]   ;;  %v1017_v23 = vld [vmem:[#allocation5 + $0x80] ss:$8 sps:$4 sm:$0xff]  }
  0x52   :  { %368 = vmatprep.mubr.bf16.mxu0 %v85_v14  ;;  %626 = vmatprep.subr.bf16.mxu1 %v1048_v18  ;;  %v1054_v24 = vld [vmem:[#allocation7 + $0x24] ss:$8 sps:$4 sm:$0xff]   ;;  %v1056_v26 = vld [vmem:[#allocation7 + $0x20] ss:$8 sps:$4 sm:$0xff]   ;;  %v1057_v28 = vld [vmem:[#allocation7 + $0x34] ss:$8 sps:$4 sm:$0xff]  }
  0x53   :  { %627 = vmatpush1.bf16.msra.mxu1 %v1050_v19  ;;  %v1018_v25 = vld [vmem:[#allocation5 + $0x94] ss:$8 sps:$4 sm:$0xff]   ;;  %v1020_v27 = vld [vmem:[#allocation5 + $0x90] ss:$8 sps:$4 sm:$0xff]   ;;  %v1021_v29 = vld [vmem:[#allocation5 + $0xa4] ss:$8 sps:$4 sm:$0xff]  }
  0x54   :  { %341 = vmatpush1.bf16.msra.mxu0 %v999_v5  ;;  %628 = vmatprep.subr.bf16.mxu1 %v1051_v21  ;;  %v1059_v30 = vld [vmem:[#allocation7 + $0x30] ss:$8 sps:$4 sm:$0xff]   ;;  %v1060_v32 = vld [vmem:[#allocation7 + $0x44] ss:$8 sps:$4 sm:$0xff]   ;;  %v1062_v34 = vld [vmem:[#allocation7 + $0x40] ss:$8 sps:$4 sm:$0xff]  }
  0x55   :  { %342 = vmatprep.subr.bf16.mxu0 %v1000_v6  ;;  %v1023_v31 = vld [vmem:[#allocation5 + $0xa0] ss:$8 sps:$4 sm:$0xff]   ;;  %v1024_v33 = vld [vmem:[#allocation5 + $0xb4] ss:$8 sps:$4 sm:$0xff]   ;;  %v1026_v35 = vld [vmem:[#allocation5 + $0xb0] ss:$8 sps:$4 sm:$0xff]  }
  0x56   :  { %v1063_v36 = vld [vmem:[#allocation7 + $0x54] ss:$8 sps:$4 sm:$0xff]   ;;  %v1065_v38 = vld [vmem:[#allocation7 + $0x50] ss:$8 sps:$4 sm:$0xff]   ;;  %v1066_v40 = vld [vmem:[#allocation7 + $0x64] ss:$8 sps:$4 sm:$0xff]  }
  0x57   :  { %629 = vmatpush1.bf16.msra.mxu1 %v1053_v22  ;;  %v1027_v37 = vld [vmem:[#allocation5 + $0xc4] ss:$8 sps:$4 sm:$0xff]   ;;  %v1029_v39 = vld [vmem:[#allocation5 + $0xc0] ss:$8 sps:$4 sm:$0xff]   ;;  %v1030_v41 = vld [vmem:[#allocation5 + $0xd4] ss:$8 sps:$4 sm:$0xff]  }
  0x58   :  { %343 = vmatpush1.bf16.msra.mxu0 %v1002_v7  ;;  %630 = vmatprep.subr.bf16.mxu1 %v1054_v24  ;;  %v1068_v42 = vld [vmem:[#allocation7 + $0x60] ss:$8 sps:$4 sm:$0xff]   ;;  %v1069_v44 = vld [vmem:[#allocation7 + $0x74] ss:$8 sps:$4 sm:$0xff]   ;;  %v1071_v46 = vld [vmem:[#allocation7 + $0x70] ss:$8 sps:$4 sm:$0xff]  }
  0x59   :  { %344 = vmatprep.subr.bf16.mxu0 %v1003_v8  ;;  %v1032_v43 = vld [vmem:[#allocation5 + $0xd0] ss:$8 sps:$4 sm:$0xff]   ;;  %v1033_v45 = vld [vmem:[#allocation5 + $0xe4] ss:$8 sps:$4 sm:$0xff]   ;;  %v1035_v47 = vld [vmem:[#allocation5 + $0xe0] ss:$8 sps:$4 sm:$0xff]  }
  0x5a   :  { %v1072_v48 = vld [vmem:[#allocation7 + $0x84] ss:$8 sps:$4 sm:$0xff]   ;;  %v1074_v50 = vld [vmem:[#allocation7 + $0x80] ss:$8 sps:$4 sm:$0xff]   ;;  %v81_v52 = vld [vmem:[#allocation2] sm:$0xff]  ;;  %vm329_vm0 = vcmask 1045504  }
  0x5b   :  { %631 = vmatpush1.bf16.msra.mxu1 %v1056_v26  ;;  %v1036_v49 = vld [vmem:[#allocation5 + $0xf4] ss:$8 sps:$4 sm:$0xff]   ;;  %v1038_v51 = vld [vmem:[#allocation5 + $0xf0] ss:$8 sps:$4 sm:$0xff]   ;;  %v1075_v53 = vld [vmem:[#allocation7 + $0x94] ss:$8 sps:$4 sm:$0xff]   ;;  %v84_v55 = vpack.c.bf16 %v81_v52, %v81_v52 }
  0x5c   :  { %345 = vmatpush1.bf16.msra.mxu0 %v1005_v9  ;;  %632 = vmatprep.subr.bf16.mxu1 %v1057_v28  ;;  %v1041_v54 = vld [vmem:[#allocation5 + $0x104] ss:$8 sps:$4 sm:$0xff]   ;;  %v1077_v56 = vld [vmem:[#allocation7 + $0x90] ss:$8 sps:$4 sm:$0xff]   ;;  %v1044_v58 = vld [vmem:[#allocation5 + $0x114] ss:$8 sps:$4 sm:$0xff]  }
  0x5d   :  { %346 = vmatprep.subr.bf16.mxu0 %v1006_v10  ;;  %v1039_v57 = vld [vmem:[#allocation5 + $0x100] ss:$8 sps:$4 sm:$0xff]   ;;  %v1078_v59 = vld [vmem:[#allocation7 + $0xa4] ss:$8 sps:$4 sm:$0xff]   ;;  %v1080_v60 = vld [vmem:[#allocation7 + $0xa0] ss:$8 sps:$4 sm:$0xff]  }
  0x5e   :  { %v1042_v61 = vld [vmem:[#allocation5 + $0x110] ss:$8 sps:$4 sm:$0xff]   ;;  %v1081_v63 = vld [vmem:[#allocation7 + $0xb4] ss:$8 sps:$4 sm:$0xff]   ;;  %v1083_v2 = vld [vmem:[#allocation7 + $0xb0] ss:$8 sps:$4 sm:$0xff]  }
  0x5f   :  { %633 = vmatpush1.bf16.msra.mxu1 %v1059_v30  ;;  %v1045_v0 = vld [vmem:[#allocation5 + $0x124] ss:$8 sps:$4 sm:$0x3f]   ;;  %v1047_v1 = vld [vmem:[#allocation5 + $0x120] ss:$8 sps:$4 sm:$0x3f]  }
  0x60   :  { %347 = vmatpush1.bf16.msra.mxu0 %v1008_v11  ;;  %634 = vmatprep.subr.bf16.mxu1 %v1060_v32  ;;  %v83_v3 = vld [vmem:[#allocation2 + $0x10] sm:$0xff]  ;;  %v331_v5 = vsel %vm329_vm0, %v1047_v1, 0  ;;  %vm325_vm1 = vcmask 359424   ;;  %v1087_v8 = vld [vmem:[#allocation7 + $0xd4] ss:$8 sps:$4 sm:$0xff]   ;;  %v1096_v14 = vld [vmem:[#allocation8 + $0x40] sm:$0xff]  }
  0x61   :  { %348 = vmatprep.subr.bf16.mxu0 %v1009_v12  ;;  %v1084_v4 = vld [vmem:[#allocation7 + $0xc4] ss:$8 sps:$4 sm:$0xff]   ;;  %v86_v6 = vpack.c.bf16 %v83_v3, %v83_v3  ;;  %v1086_v7 = vld [vmem:[#allocation7 + $0xc0] ss:$8 sps:$4 sm:$0xff]   ;;  %v1089_v9 = vld [vmem:[#allocation7 + $0xd0] ss:$8 sps:$4 sm:$0xff]  }
  0x62   :  { %v1090_v10 = vld [vmem:[#allocation7 + $0xe4] ss:$8 sps:$4 sm:$0xff]   ;;  %v1092_v11 = vld [vmem:[#allocation7 + $0xe0] ss:$8 sps:$4 sm:$0xff]   ;;  %v1093_v12 = vld [vmem:[#allocation7 + $0xf4] ss:$8 sps:$4 sm:$0xff]  }
  0x63   :  { %635 = vmatpush1.bf16.msra.mxu1 %v1062_v34  ;;  %v1095_v13 = vld [vmem:[#allocation7 + $0xf0] ss:$8 sps:$4 sm:$0xff]   ;;  %v1099_v34 = vld [vmem:[#allocation8 + $0x8] sm:$0xff]  }
  0x64   :  { %349 = vmatpush1.bf16.msra.mxu0 %v1011_v15  ;;  %636 = vmatprep.subr.bf16.mxu1 %v1063_v36  ;;  %v127_v15 = vlaneseq  ;;  %v125_v18 = vld [vmem:[%s1357_s2] sm:$0x3]  ;;  %v1101_v36 = vld [vmem:[#allocation8 + $0x10] sm:$0xff]  }
  0x65   :  { %350 = vmatprep.subr.bf16.mxu0 %v1012_v16 }
  0x66   :  { %v128_v16 = vshrl.u32 %v127_v15, 7 }
  0x67   :  { %637 = vmatpush1.bf16.msra.mxu1 %v1065_v38  ;;  %v1103_v38 = vld [vmem:[#allocation8 + $0x18] sm:$0xff]  }
  0x68   :  { %351 = vmatpush1.bf16.msra.mxu0 %v1014_v17  ;;  %638 = vmatprep.subr.bf16.mxu1 %v1066_v40  ;;  %v129_v17 = vsub.s32 0, %v128_v16  ;;  %v133_v19 = vsub.s32 1, %v128_v16  ;;  %v1105_v40 = vld [vmem:[#allocation8 + $0x20] sm:$0xff]  }
  0x69   :  { %352 = vmatprep.subr.bf16.mxu0 %v1015_v20 }
  0x6a   :  { %v130_v20 = vrot.slane %v125_v18, %v129_v17  ;;  %v134_v21 = vrot.slane %v125_v18, %v133_v19 }
  0x6b   :  { %639 = vmatpush1.bf16.msra.mxu1 %v1068_v42  ;;  %v1107_v42 = vld [vmem:[#allocation8 + $0x28] sm:$0xff]  }
  0x6c   :  { %353 = vmatpush1.bf16.msra.mxu0 %v1017_v23  ;;  %640 = vmatprep.subr.bf16.mxu1 %v1069_v44  ;;  %v1109_v44 = vld [vmem:[#allocation8 + $0x30] sm:$0xff]  }
  0x6d   :  { %354 = vmatprep.subr.bf16.mxu0 %v1018_v25 }
  0x6f   :  { %641 = vmatpush1.bf16.msra.mxu1 %v1071_v46  ;;  %v1111_v46 = vld [vmem:[#allocation8 + $0x38] sm:$0xff]  }
  0x70   :  { %355 = vmatpush1.bf16.msra.mxu0 %v1020_v27  ;;  %642 = vmatprep.subr.bf16.mxu1 %v1072_v48 }
  0x71   :  { %356 = vmatprep.subr.bf16.mxu0 %v1021_v29 }
  0x73   :  { %643 = vmatpush1.bf16.msra.mxu1 %v1074_v50 }
  0x74   :  { %357 = vmatpush1.bf16.msra.mxu0 %v1023_v31  ;;  %644 = vmatprep.subr.bf16.mxu1 %v1075_v53  ;;  %v1097_v31 = vld [vmem:[#allocation8] sm:$0xff]  }
  0x75   :  { %358 = vmatprep.subr.bf16.mxu0 %v1024_v33  ;;  %v1098_v33 = vld [vmem:[#allocation8 + $0x48] sm:$0xff]  }
  0x77   :  { %645 = vmatpush1.bf16.msra.mxu1 %v1077_v56 }
  0x78   :  { %359 = vmatpush1.bf16.msra.mxu0 %v1026_v35  ;;  %646 = vmatprep.subr.bf16.mxu1 %v1078_v59  ;;  %v1100_v35 = vld [vmem:[#allocation8 + $0x50] sm:$0xff]  }
  0x79   :  { %360 = vmatprep.subr.bf16.mxu0 %v1027_v37  ;;  %v1102_v37 = vld [vmem:[#allocation8 + $0x58] sm:$0xff]  }
  0x7b   :  { %647 = vmatpush1.bf16.msra.mxu1 %v1080_v60 }
  0x7c   :  { %361 = vmatpush1.bf16.msra.mxu0 %v1029_v39  ;;  %648 = vmatprep.subr.bf16.mxu1 %v1081_v63  ;;  %v1104_v39 = vld [vmem:[#allocation8 + $0x60] sm:$0xff]  }
  0x7d   :  { %362 = vmatprep.subr.bf16.mxu0 %v1030_v41  ;;  %v1106_v41 = vld [vmem:[#allocation8 + $0x68] sm:$0xff]  }
  0x7f   :  { %649 = vmatpush1.bf16.msra.mxu1 %v1083_v2 }
  0x80   :  { %363 = vmatpush1.bf16.msra.mxu0 %v1032_v43  ;;  %650 = vmatprep.subr.bf16.mxu1 %v1084_v4  ;;  %v1108_v43 = vld [vmem:[#allocation8 + $0x70] sm:$0xff]  }
  0x81   :  { %364 = vmatprep.subr.bf16.mxu0 %v1033_v45  ;;  %v1110_v45 = vld [vmem:[#allocation8 + $0x78] sm:$0xff]  }
  0x83   :  { %651 = vmatpush1.bf16.msra.mxu1 %v1086_v7 }
  0x84   :  { %365 = vmatpush1.bf16.msra.mxu0 %v1035_v47  ;;  %652 = vmatprep.subr.bf16.mxu1 %v1087_v8  ;;  %v454_v47 = vld [vmem:[%s1359_s4] sm:$0x3]  ;;  %s1239_s4 = smov [#allocation10]  }
  0x85   :  { %366 = vmatprep.subr.bf16.mxu0 %v1036_v49  ;;  %v459_v48 = vrot.slane %v454_v47, %v129_v17  ;;  %v463_v49 = vrot.slane %v454_v47, %v133_v19  ;;  %s853_s30 = sshll.u32 %s1239_s4, 4  ;;  %s854_s30 = int_to_ptr.vmem [resolvable:$true] %s853_s30 }
  0x86   :  { %s1200_s8 = scalar_lea.vmem %s854_s30, 128  ;;  %p1205_p5 = scmp.lt.s32.totalorder %s854_s30, %s854_s30 }
  0x87   :  { %653 = vmatpush1.bf16.msra.mxu1 %v1089_v9  ;;  %p1201_p4 = scmp.ne.s32.totalorder %s854_s30, %s1200_s8  ;;  %p1206_p6 = scmp.lt.s32.totalorder %s1200_s8, %s1200_s8 }
  0x88   :  { %367 = vmatpush1.bf16.msra.mxu0 %v1038_v51  ;;  %654 = vmatprep.subr.bf16.mxu1 %v1090_v10 }
  0x89   :  { %377 = vmatprep.subr.bf16.mxu0 %v1041_v54  ;;  %p1207_p7 = por %p1206_p6, %p1205_p5 }
  0x8b   :  { %369 = vmatmul.mubr.bf16.vlgmr.msra.gmra.mrb[0].mxu0 %v84_v55  ;;  %655 = vmatpush1.bf16.msra.mxu1 %v1092_v11  ;;  %p1208_p8 = pnand %p1207_p7, %p1201_p4 }
  0x8c   :  { %378 = vmatpush1.bf16.msra.mxu0 %v1039_v57  ;;  %409 = vmatprep.mubr.bf16.mxu0 %v1238_v62 }
  0x8d   :  { %379 = vmatprep.subr.bf16.mxu0 %v1044_v58  ;;  %656 = vmatprep.subr.bf16.mxu1 %v1093_v12 }
  0x8f   :  { %657 = vmatpush1.bf16.msra.mxu1 %v1095_v13 }
  0x90   :  { %380 = vmatpush1.bf16.msra.mxu0 %v1042_v61  ;;  %953 = vmatprep.subr.bf16.mxu1 %v1096_v14  ;;  %v936_v61 = vld [vmem:[%s1361_s6] ss:$0 sm:$0xff] }
  0x91   :  { %902 = vmatprep.subr.msk.bf16.mxu0 %vm329_vm0, %v1045_v0 }
  0x94   :  { %382 = vmatpush1.bf16.msra.mxu0 %v331_v5 }
  0x97   :  { %903 = vmatmul.mubr.msk.bf16.vlgmr.msra.gmra.mrb[0].mxu0 %vm325_vm1, %v86_v6 }
 0x16a   :  { %v411_v22 = vpop.f32.mrb[0].mxu0 }
 0x16b   :  { %v975_v23 = vadd.f32 %v411_v22, %v130_v20  ;;  %v413_v24 = vpop.f32.mrb[1].mxu0 }
 0x16c   :  { %v976_v25 = vadd.f32 %v413_v24, %v134_v21  ;;  %v415_v26 = vpop.f32.mrb[2].mxu0 }
 0x16d   :  { %v418_v27 = vmax.f32 %v975_v23, 0.0  ;;  %v416_v28 = vpop.f32.mrb[3].mxu0 }
 0x16e   :  { %v419_v29 = vmax.f32 %v976_v25, 0.0 }
 0x16f   :  { %v420_v32 = vpack.c.bf16 %v418_v27, %v418_v27 }
 0x170   :  { %v421_v30 = vpack.c.bf16 %v419_v29, %v419_v29 }
 0x172   :  { %658 = vmatprep.mubr.bf16.mxu1 %v421_v30 }
 0x173   :  { %659 = vmatmul.mubr.bf16.vlgmr.msra.gmra.mrb[0].mxu1 %v420_v32 }
 0x174   :  { %954 = vmatpush3.bf16.msra.mxu1 %v1097_v31 }
 0x175   :  { %955 = vmatprep.subr.bf16.mxu1 %v1098_v33 }
 0x178   :  { %956 = vmatpush3.bf16.msra.mxu1 %v1099_v34 }
 0x179   :  { %957 = vmatprep.subr.bf16.mxu1 %v1100_v35 }
 0x17c   :  { %958 = vmatpush3.bf16.msra.mxu1 %v1101_v36 }
 0x17d   :  { %959 = vmatprep.subr.bf16.mxu1 %v1102_v37 }
 0x180   :  { %960 = vmatpush3.bf16.msra.mxu1 %v1103_v38 }
 0x181   :  { %961 = vmatprep.subr.bf16.mxu1 %v1104_v39 }
 0x184   :  { %962 = vmatpush3.bf16.msra.mxu1 %v1105_v40 }
 0x185   :  { %963 = vmatprep.subr.bf16.mxu1 %v1106_v41 }
 0x188   :  { %964 = vmatpush3.bf16.msra.mxu1 %v1107_v42 }
 0x189   :  { %965 = vmatprep.subr.bf16.mxu1 %v1108_v43 }
 0x18c   :  { %966 = vmatpush3.bf16.msra.mxu1 %v1109_v44 }
 0x18d   :  { %967 = vmatprep.subr.bf16.mxu1 %v1110_v45 }
 0x190   :  { %968 = vmatpush3.bf16.msra.mxu1 %v1111_v46 }
 0x246   :  { %v660_v50 = vpop.f32.mrb[0].mxu1 }
 0x247   :  { %v661_v51 = vadd.f32 %v660_v50, %v459_v48  ;;  %v662_v52 = vpop.f32.mrb[1].mxu1 }
 0x248   :  { %v663_v53 = vadd.f32 %v662_v52, %v463_v49  ;;  %v664_v54 = vpop.f32.mrb[2].mxu1 }
 0x249   :  { %v667_v55 = vmax.f32 %v661_v51, 0.0  ;;  %v665_v56 = vpop.f32.mrb[3].mxu1 }
 0x24a   :  { %v668_v57 = vmax.f32 %v663_v53, 0.0 }
 0x24b   :  { %v669_v59 = vpack.c.bf16 %v667_v55, %v667_v55 }
 0x24c   :  { %v670_v58 = vpack.c.bf16 %v668_v57, %v668_v57 }
 0x24e   :  { %838 = vmatprep.mubr.bf16.mxu1 %v670_v58 }
 0x24f   :  { %839 = vmatmul.mubr.bf16.vlgmr.msra.gmra.mrb[4].mxu1 %v669_v59 }
 0x322   :  { %v969_v60 = vpop.f32.mrb[4].mxu1 }
 0x323   :  { %v970_v62 = vpop.f32.mrb[5].mxu1 }
 0x324   :  { %v971_v63 = vadd.f32 %v970_v62, %v969_v60  ;;  %v972_v0 = vpop.f32.mrb[6].mxu1 }
 0x325   :  { %v973_v1 = vpop.f32.mrb[7].mxu1 }
 0x326   :  { %v841_v2 = vadd.f32 %v971_v63, %v936_v61 }
 0x328   :  { %846 = vst [vmem:[#allocation10] sm:$0xff] %v841_v2 }
 0x329   :  { %1211 = shalt.err (!%p1208_p8)
}
 0x32a   :  { %s1212_s6 = scalar_lea.hbm %s1362_s7, 128 }
 0x32b   :  { %p1213_p9 = scmp.ne.s32.totalorder %s1362_s7, %s1212_s6  ;;  %p1216_p10 = scmp.lt.u32.totalorder %s1212_s6, %s1362_s7 }
 0x32d   :  { %p1218_p11 = pnand %p1216_p10, %p1213_p9 }
 0x32f   :  { %1221 = shalt.err (!%p1218_p11)
}
 0x330   :  { %856 = dma.vmem_to_hbm [thread:$0]  %s854_s30, 128, %s1362_s7, [#allocation4]  }
 0x331   :  { %1228 = dma.done.wait [#allocation4], 128  }
 0x332   :  { %1229 = vsyncadd [#allocation4], 4294967168 }
 0x333   :  { %860 = vsyncpa [#allocation3], 1 }
 0x334   :  { %861 = vsyncpa [#allocation6], 1 }
 0x335   :  { %862 = vsyncpa [#allocation9], 1 }
 0x336   :  { %863 = vsyncpa [#allocation4], 1 }

</bundles_post_ra>
